<compile_context>
chip_gen: v5e
topology: v5e:2x2
jax: 0.10.0
libtpu: 0.0.40
codegen_flags: <defaults>
</compile_context>

<pallas_src>
import jax
import jax.numpy as jnp
from jax import lax
from jax.experimental import pallas as pl
from jax.experimental.pallas import tpu as pltpu


def _round_up(a: int, b: int) -> int:
    return -(-a // b) * b


def _downsample_kernel(xe_ref, xo_ref, top_ref, bot_ref, o_ref):
    # xe_ref / xo_ref : (2*th_o, wo, ln)  even / odd input columns of this h-tile
    # top_ref/bot_ref : (2, wo, ln)       rows just above/below the tile
    #                                     (clamped by the index_map => replication)
    #                                     [0] = even columns, [1] = odd columns
    # o_ref           : (th_o, wo, ln)
    th_o, wo, _ = o_ref.shape
    hm = xe_ref.shape[0]            # == 2 * th_o
    f32 = jnp.float32

    # Column-edge masks for the replication pad on the w axis (hoisted; JAX
    # does not CSE broadcast_in_dim inside loops).
    col = lax.broadcasted_iota(jnp.int32, (wo, 1), 0)
    first_col = col == 0
    last_col = col == wo - 1

    def one_row(i, carry):
        r1 = 2 * i
        r2 = r1 + 1
        r0 = jnp.maximum(r1 - 1, 0)        # in-bounds dummy; replaced when i == 0
        r3 = jnp.minimum(r1 + 2, hm - 1)   # in-bounds dummy; replaced when i == th_o-1
        first = i == 0
        last = i == th_o - 1

        # Vertical [1, 3, 3, 1]/8 (stride 2), factored weights, even/odd columns.
        e0 = jnp.where(first, top_ref[0].astype(f32), xe_ref[r0].astype(f32))
        e3 = jnp.where(last, bot_ref[0].astype(f32), xe_ref[r3].astype(f32))
        tve = 0.125 * (e0 + e3) + 0.375 * (xe_ref[r1].astype(f32)
                                           + xe_ref[r2].astype(f32))

        o0 = jnp.where(first, top_ref[1].astype(f32), xo_ref[r0].astype(f32))
        o3 = jnp.where(last, bot_ref[1].astype(f32), xo_ref[r3].astype(f32))
        tvo = 0.125 * (o0 + o3) + 0.375 * (xo_ref[r1].astype(f32)
                                           + xo_ref[r2].astype(f32))

        # Horizontal [1, 3, 3, 1]/8, stride 2:
        #   out[j] = (tv[2j-1] + 3 tv[2j] + 3 tv[2j+1] + tv[2j+2]) / 8
        # tv[2j] = tve[j], tv[2j+1] = tvo[j]; neighbours via XLU rolls, with a
        # one-row where() fix at each column edge (replication pad).
        prev_o = jnp.where(first_col, tve[0:1], pltpu.roll(tvo, 1, axis=0))
        next_e = jnp.where(last_col, tvo[wo - 1:wo], pltpu.roll(tve, wo - 1, axis=0))
        out = 0.375 * (tve + tvo) + 0.125 * (prev_o + next_e)
        o_ref[i] = out.astype(o_ref.dtype)
        return carry

    # Full unroll for short tiles gives the LLO scheduler visibility to overlap
    # the 8-10 row loads with the VALU chain.
    lax.fori_loop(0, th_o, one_row, 0, unroll=th_o <= 8)


def _pick_tiling(ho, wo, n, itemsize):
    """Choose (th_o, ln, n_pad, g_lane, g_h, vmem_limit)."""
    n128 = _round_up(max(n, 1), 128)
    try:  # generation-aware budget: v7x has 64 MiB/TC vs 128 MiB on v5e/v6e.
        vmem_cap = int(pltpu.get_tpu_info().vmem_capacity_bytes)
    except Exception:
        vmem_cap = 64 * 1024 * 1024
    # Per-step (single-buffered) block budget; Pallas double-buffers each
    # BlockSpec, so real VMEM use is ~2x this (plus tiny halos).
    step_budget = max(1 << 20, min(8 << 20, vmem_cap // 8))
    vmem_limit = int(min(max(vmem_cap // 2, 32 << 20), 64 << 20))

    def block_bytes(th, ln):
        # even + odd main (2 * 2*th rows) + top/bot halos (4 rows) + output (th rows)
        return ln * wo * itemsize * (5 * th + 4)

    # Largest output-row tile (divisor of ho -> clean blocked index maps) that
    # fits the budget at the minimum 128-lane width.
    th_o = 1
    for d in range(1, ho + 1):
        if ho % d == 0 and block_bytes(d, 128) <= step_budget:
            th_o = d
    # Lane width: fill the remaining budget; multiple of 128, no artificial cap.
    ln_cap = step_budget // (wo * itemsize * (5 * th_o + 4))
    ln = max(128, (min(ln_cap, n128) // 128) * 128)

    n_pad = _round_up(n, ln)
    g_lane, g_h = n_pad // ln, ho // th_o
    # Keep the total grid-step count even so both v7x TensorCores get work.
    if (g_lane * g_h) % 2 == 1:
        if th_o % 2 == 0:
            th_o //= 2
        elif ln >= 256:
            ln = _round_up(ln // 2, 128)
            n_pad = _round_up(n, ln)
        g_lane, g_h = n_pad // ln, ho // th_o
    return th_o, ln, n_pad, g_lane, g_h, vmem_limit


def downsample(x: jax.Array) -> jax.Array:
    """Equivalent of Downsample.forward (Smooth + 0.5x bilinear). x: (bs, ic, h, w)."""
    bs, ic, h, w = x.shape
    assert h % 2 == 0 and w % 2 == 0, "Downsample expects even spatial dims"
    ho, wo = h // 2, w // 2
    n = bs * ic
    itemsize = jnp.dtype(x.dtype).itemsize

    th_o, ln, n_pad, g_lane, g_h, vmem_limit = _pick_tiling(ho, wo, n, itemsize)
    two_th = 2 * th_o

    # ---- layout glue: one transpose(+pad) in, one transpose out ----
    # (bs, ic, h, w) -> (n, h, wo, 2) is a free reshape; a single transpose puts
    # the column parity outermost and bs*ic on lanes.  The lane pad fuses with
    # the transpose copy; no separate even/odd slice materialization.
    xt = jnp.transpose(x.reshape(n, h, wo, 2), (3, 1, 2, 0))      # (2, h, wo, n)
    xt = jnp.pad(xt, ((0, 0), (0, 0), (0, 0), (0, n_pad - n)))

    flops = 15 * n_pad * ho * wo
    bytes_accessed = itemsize * n_pad * (h * w + ho * wo + 4 * wo * g_h)

    in_specs = [
        # even / odd columns of the current h-tile (2*th_o input rows each)
        pl.BlockSpec((None, two_th, wo, ln), lambda lj, hi: (0, hi, 0, lj)),
        pl.BlockSpec((None, two_th, wo, ln), lambda lj, hi: (1, hi, 0, lj)),
        # 1-row halos above / below the tile; edge clamping == replication pad
        pl.BlockSpec((2, None, wo, ln),
                     lambda lj, hi: (0, jnp.maximum(two_th * hi - 1, 0), 0, lj)),
        pl.BlockSpec((2, None, wo, ln),
                     lambda lj, hi: (0, jnp.minimum(two_th * (hi + 1), h - 1), 0, lj)),
    ]

    out = pl.pallas_call(
        _downsample_kernel,
        out_shape=jax.ShapeDtypeStruct((ho, wo, n_pad), x.dtype),
        grid_spec=pltpu.PrefetchScalarGridSpec(
            num_scalar_prefetch=0,
            grid=(g_lane, g_h),
            in_specs=in_specs,
            out_specs=pl.BlockSpec((th_o, wo, ln), lambda lj, hi: (hi, 0, lj)),
        ),
        compiler_params=pltpu.CompilerParams(
            dimension_semantics=("parallel", "parallel"),
            vmem_limit_bytes=vmem_limit,
        ),
        cost_estimate=pl.CostEstimate(
            flops=flops, transcendentals=0, bytes_accessed=bytes_accessed),
    )(xt, xt, xt, xt)                                             # (ho, wo, n_pad)

    out = out[:, :, :n]                                           # drop padded lanes
    return jnp.transpose(out, (2, 0, 1)).reshape(bs, ic, ho, wo)


def _reference(x: jax.Array) -> jax.Array:
    """Pure-JAX reference: replication pad + 3x3 FIR + 0.5x bilinear (== 2x2 mean)."""
    bs, ic, h, w = x.shape
    n = bs * ic
    k = jnp.array([[1.0, 2.0, 1.0],
                   [2.0, 4.0, 2.0],
                   [1.0, 2.0, 1.0]], dtype=jnp.float32) / 16.0
    xr = x.astype(jnp.float32).reshape(n, h, w)
    xp = jnp.pad(xr, ((0, 0), (1, 1), (1, 1)), mode="edge")
    s = jnp.zeros((n, h, w), jnp.float32)
    for dy in range(3):
        for dx in range(3):
            s = s + k[dy, dx] * xp[:, dy:dy + h, dx:dx + w]
    # F.interpolate(scale_factor=0.5, mode='bilinear', align_corners=False)
    # for an exact 2x downscale is a 2x2 average pool.
    p = s.reshape(n, h // 2, 2, w // 2, 2).mean(axis=(2, 4))
    return p.reshape(bs, ic, h // 2, w // 2).astype(x.dtype)


if __name__ == "__main__":
    key = jax.random.PRNGKey(0)
    x = jax.random.normal(key, (2, 4, 16, 16), dtype=jnp.float32)

    y = jax.jit(downsample)(x)
    jax.block_until_ready(y)

    y_ref = _reference(x)
    assert y.shape == (2, 4, 8, 8), y.shape
    assert jnp.allclose(y, y_ref, atol=1e-5, rtol=1e-5), (
        "mismatch vs reference, max abs err = %g"
        % float(jnp.max(jnp.abs(y - y_ref))))

    print("KERNEL_OK")
</pallas_src>

<mosaic_0001>
module attributes {stable_mosaic.version = 11 : i64} {
  func.func @_downsample_kernel(%arg0: i32, %arg1: i32, %arg2: memref<1x8x8x128xf32, #tpu.memory_space<vmem>>, %arg3: memref<1x8x8x128xf32, #tpu.memory_space<vmem>>, %arg4: memref<2x1x8x128xf32, #tpu.memory_space<vmem>>, %arg5: memref<2x1x8x128xf32, #tpu.memory_space<vmem>>, %arg6: memref<4x8x128xf32, #tpu.memory_space<vmem>>) attributes {dimension_semantics = [#tpu.dimension_semantics<parallel>, #tpu.dimension_semantics<parallel>], iteration_bounds = array<i64: 1, 2>, scalar_prefetch = 0 : i64, scratch_operands = 0 : i64, tpu.core_type = #tpu.core_type<tc>, window_params = [{transform_indices = @transform_0, window_bounds = array<i64: 1, 8, 8, 128>}, {transform_indices = @transform_1, window_bounds = array<i64: 1, 8, 8, 128>}, {transform_indices = @transform_2, window_bounds = array<i64: 2, 1, 8, 128>}, {transform_indices = @transform_3, window_bounds = array<i64: 2, 1, 8, 128>}, {transform_indices = @transform_4, window_bounds = array<i64: 4, 8, 128>}]} {
    %0 = tpu.iota {dimensions = array<i32: 0>} : vector<8x1xi32>
    %c0_i32 = arith.constant 0 : i32
    %1 = vector.broadcast %c0_i32 : i32 to vector<8x1xi32>
    %2 = arith.cmpi eq, %0, %1 : vector<8x1xi32>
    %c7_i32 = arith.constant 7 : i32
    %3 = vector.broadcast %c7_i32 : i32 to vector<8x1xi32>
    %4 = arith.cmpi eq, %0, %3 : vector<8x1xi32>
    %c0_i32_0 = arith.constant 0 : i32
    %c2_i32 = arith.constant 2 : i32
    %5 = arith.muli %c2_i32, %c0_i32_0 : i32
    %c1_i32 = arith.constant 1 : i32
    %6 = arith.addi %5, %c1_i32 : i32
    %c1_i32_1 = arith.constant 1 : i32
    %7 = arith.subi %5, %c1_i32_1 : i32
    %c0_i32_2 = arith.constant 0 : i32
    %8 = arith.maxsi %7, %c0_i32_2 : i32
    %c2_i32_3 = arith.constant 2 : i32
    %9 = arith.addi %5, %c2_i32_3 : i32
    %c7_i32_4 = arith.constant 7 : i32
    %10 = arith.minsi %9, %c7_i32_4 : i32
    %c0_i32_5 = arith.constant 0 : i32
    %11 = arith.cmpi eq, %c0_i32_0, %c0_i32_5 : i32
    %c3_i32 = arith.constant 3 : i32
    %12 = arith.cmpi eq, %c0_i32_0, %c3_i32 : i32
    %c0 = arith.constant 0 : index
    %c0_6 = arith.constant 0 : index
    %c0_7 = arith.constant 0 : index
    %c0_8 = arith.constant 0 : index
    %13 = vector.load %arg4[%c0, %c0_6, %c0_7, %c0_8] : memref<2x1x8x128xf32, #tpu.memory_space<vmem>>, vector<1x1x8x128xf32>
    %14 = vector.shape_cast %13 : vector<1x1x8x128xf32> to vector<8x128xf32>
    %c0_9 = arith.constant 0 : index
    %15 = arith.index_cast %8 : i32 to index
    %c0_10 = arith.constant 0 : index
    %c0_11 = arith.constant 0 : index
    %16 = vector.load %arg2[%c0_9, %15, %c0_10, %c0_11] : memref<1x8x8x128xf32, #tpu.memory_space<vmem>>, vector<1x1x8x128xf32>
    %17 = vector.shape_cast %16 : vector<1x1x8x128xf32> to vector<8x128xf32>
    %18 = arith.select %11, %14, %17 : vector<8x128xf32>
    %c0_12 = arith.constant 0 : index
    %c0_13 = arith.constant 0 : index
    %c0_14 = arith.constant 0 : index
    %c0_15 = arith.constant 0 : index
    %19 = vector.load %arg5[%c0_12, %c0_13, %c0_14, %c0_15] : memref<2x1x8x128xf32, #tpu.memory_space<vmem>>, vector<1x1x8x128xf32>
    %20 = vector.shape_cast %19 : vector<1x1x8x128xf32> to vector<8x128xf32>
    %c0_16 = arith.constant 0 : index
    %21 = arith.index_cast %10 : i32 to index
    %c0_17 = arith.constant 0 : index
    %c0_18 = arith.constant 0 : index
    %22 = vector.load %arg2[%c0_16, %21, %c0_17, %c0_18] : memref<1x8x8x128xf32, #tpu.memory_space<vmem>>, vector<1x1x8x128xf32>
    %23 = vector.shape_cast %22 : vector<1x1x8x128xf32> to vector<8x128xf32>
    %24 = arith.select %12, %20, %23 : vector<8x128xf32>
    %25 = arith.addf %18, %24 : vector<8x128xf32>
    %cst = arith.constant 1.250000e-01 : f32
    %26 = vector.broadcast %cst : f32 to vector<8x128xf32>
    %27 = arith.mulf %26, %25 : vector<8x128xf32>
    %c0_19 = arith.constant 0 : index
    %28 = arith.index_cast %5 : i32 to index
    %c0_20 = arith.constant 0 : index
    %c0_21 = arith.constant 0 : index
    %29 = vector.load %arg2[%c0_19, %28, %c0_20, %c0_21] : memref<1x8x8x128xf32, #tpu.memory_space<vmem>>, vector<1x1x8x128xf32>
    %30 = vector.shape_cast %29 : vector<1x1x8x128xf32> to vector<8x128xf32>
    %c0_22 = arith.constant 0 : index
    %31 = arith.index_cast %6 : i32 to index
    %c0_23 = arith.constant 0 : index
    %c0_24 = arith.constant 0 : index
    %32 = vector.load %arg2[%c0_22, %31, %c0_23, %c0_24] : memref<1x8x8x128xf32, #tpu.memory_space<vmem>>, vector<1x1x8x128xf32>
    %33 = vector.shape_cast %32 : vector<1x1x8x128xf32> to vector<8x128xf32>
    %34 = arith.addf %30, %33 : vector<8x128xf32>
    %cst_25 = arith.constant 3.750000e-01 : f32
    %35 = vector.broadcast %cst_25 : f32 to vector<8x128xf32>
    %36 = arith.mulf %35, %34 : vector<8x128xf32>
    %37 = arith.addf %27, %36 : vector<8x128xf32>
    %c1 = arith.constant 1 : index
    %c0_26 = arith.constant 0 : index
    %c0_27 = arith.constant 0 : index
    %c0_28 = arith.constant 0 : index
    %38 = vector.load %arg4[%c1, %c0_26, %c0_27, %c0_28] : memref<2x1x8x128xf32, #tpu.memory_space<vmem>>, vector<1x1x8x128xf32>
    %39 = vector.shape_cast %38 : vector<1x1x8x128xf32> to vector<8x128xf32>
    %c0_29 = arith.constant 0 : index
    %40 = arith.index_cast %8 : i32 to index
    %c0_30 = arith.constant 0 : index
    %c0_31 = arith.constant 0 : index
    %41 = vector.load %arg3[%c0_29, %40, %c0_30, %c0_31] : memref<1x8x8x128xf32, #tpu.memory_space<vmem>>, vector<1x1x8x128xf32>
    %42 = vector.shape_cast %41 : vector<1x1x8x128xf32> to vector<8x128xf32>
    %43 = arith.select %11, %39, %42 : vector<8x128xf32>
    %c1_32 = arith.constant 1 : index
    %c0_33 = arith.constant 0 : index
    %c0_34 = arith.constant 0 : index
    %c0_35 = arith.constant 0 : index
    %44 = vector.load %arg5[%c1_32, %c0_33, %c0_34, %c0_35] : memref<2x1x8x128xf32, #tpu.memory_space<vmem>>, vector<1x1x8x128xf32>
    %45 = vector.shape_cast %44 : vector<1x1x8x128xf32> to vector<8x128xf32>
    %c0_36 = arith.constant 0 : index
    %46 = arith.index_cast %10 : i32 to index
    %c0_37 = arith.constant 0 : index
    %c0_38 = arith.constant 0 : index
    %47 = vector.load %arg3[%c0_36, %46, %c0_37, %c0_38] : memref<1x8x8x128xf32, #tpu.memory_space<vmem>>, vector<1x1x8x128xf32>
    %48 = vector.shape_cast %47 : vector<1x1x8x128xf32> to vector<8x128xf32>
    %49 = arith.select %12, %45, %48 : vector<8x128xf32>
    %50 = arith.addf %43, %49 : vector<8x128xf32>
    %cst_39 = arith.constant 1.250000e-01 : f32
    %51 = vector.broadcast %cst_39 : f32 to vector<8x128xf32>
    %52 = arith.mulf %51, %50 : vector<8x128xf32>
    %c0_40 = arith.constant 0 : index
    %53 = arith.index_cast %5 : i32 to index
    %c0_41 = arith.constant 0 : index
    %c0_42 = arith.constant 0 : index
    %54 = vector.load %arg3[%c0_40, %53, %c0_41, %c0_42] : memref<1x8x8x128xf32, #tpu.memory_space<vmem>>, vector<1x1x8x128xf32>
    %55 = vector.shape_cast %54 : vector<1x1x8x128xf32> to vector<8x128xf32>
    %c0_43 = arith.constant 0 : index
    %56 = arith.index_cast %6 : i32 to index
    %c0_44 = arith.constant 0 : index
    %c0_45 = arith.constant 0 : index
    %57 = vector.load %arg3[%c0_43, %56, %c0_44, %c0_45] : memref<1x8x8x128xf32, #tpu.memory_space<vmem>>, vector<1x1x8x128xf32>
    %58 = vector.shape_cast %57 : vector<1x1x8x128xf32> to vector<8x128xf32>
    %59 = arith.addf %55, %58 : vector<8x128xf32>
    %cst_46 = arith.constant 3.750000e-01 : f32
    %60 = vector.broadcast %cst_46 : f32 to vector<8x128xf32>
    %61 = arith.mulf %60, %59 : vector<8x128xf32>
    %62 = arith.addf %52, %61 : vector<8x128xf32>
    %63 = vector.extract_strided_slice %37 {offsets = [0, 0], sizes = [1, 128], strides = [1, 1]} : vector<8x128xf32> to vector<1x128xf32>
    %c1_i32_47 = arith.constant 1 : i32
    %64 = tpu.dynamic_rotate %62 by %c1_i32_47 dim 0 : vector<8x128xf32>, i32 -> vector<8x128xf32>
    %65 = vector.shape_cast %2 : vector<8x1xi1> to vector<8x1xi1>
    %66 = vector.broadcast %65 : vector<8x1xi1> to vector<8x128xi1>
    %67 = vector.shape_cast %63 : vector<1x128xf32> to vector<1x128xf32>
    %68 = vector.broadcast %67 : vector<1x128xf32> to vector<8x128xf32>
    %69 = arith.select %66, %68, %64 : vector<8x128xi1>, vector<8x128xf32>
    %70 = vector.extract_strided_slice %62 {offsets = [7, 0], sizes = [1, 128], strides = [1, 1]} : vector<8x128xf32> to vector<1x128xf32>
    %c7_i32_48 = arith.constant 7 : i32
    %71 = tpu.dynamic_rotate %37 by %c7_i32_48 dim 0 : vector<8x128xf32>, i32 -> vector<8x128xf32>
    %72 = vector.shape_cast %4 : vector<8x1xi1> to vector<8x1xi1>
    %73 = vector.broadcast %72 : vector<8x1xi1> to vector<8x128xi1>
    %74 = vector.shape_cast %70 : vector<1x128xf32> to vector<1x128xf32>
    %75 = vector.broadcast %74 : vector<1x128xf32> to vector<8x128xf32>
    %76 = arith.select %73, %75, %71 : vector<8x128xi1>, vector<8x128xf32>
    %77 = arith.addf %37, %62 : vector<8x128xf32>
    %cst_49 = arith.constant 3.750000e-01 : f32
    %78 = vector.broadcast %cst_49 : f32 to vector<8x128xf32>
    %79 = arith.mulf %78, %77 : vector<8x128xf32>
    %80 = arith.addf %69, %76 : vector<8x128xf32>
    %cst_50 = arith.constant 1.250000e-01 : f32
    %81 = vector.broadcast %cst_50 : f32 to vector<8x128xf32>
    %82 = arith.mulf %81, %80 : vector<8x128xf32>
    %83 = arith.addf %79, %82 : vector<8x128xf32>
    %84 = arith.index_cast %c0_i32_0 : i32 to index
    %c0_51 = arith.constant 0 : index
    %c0_52 = arith.constant 0 : index
    %85 = vector.load %arg6[%84, %c0_51, %c0_52] : memref<4x8x128xf32, #tpu.memory_space<vmem>>, vector<1x8x128xf32>
    %86 = vector.shape_cast %85 : vector<1x8x128xf32> to vector<8x128xf32>
    %87 = vector.shape_cast %83 : vector<8x128xf32> to vector<1x8x128xf32>
    tpu.vector_store %arg6[%84, %c0_51, %c0_52], %87 {strides = array<i32>} : memref<4x8x128xf32, #tpu.memory_space<vmem>>, vector<1x8x128xf32>,
    %c1_i32_53 = arith.constant 1 : i32
    %c2_i32_54 = arith.constant 2 : i32
    %88 = arith.muli %c2_i32_54, %c1_i32_53 : i32
    %c1_i32_55 = arith.constant 1 : i32
    %89 = arith.addi %88, %c1_i32_55 : i32
    %c1_i32_56 = arith.constant 1 : i32
    %90 = arith.subi %88, %c1_i32_56 : i32
    %c0_i32_57 = arith.constant 0 : i32
    %91 = arith.maxsi %90, %c0_i32_57 : i32
    %c2_i32_58 = arith.constant 2 : i32
    %92 = arith.addi %88, %c2_i32_58 : i32
    %c7_i32_59 = arith.constant 7 : i32
    %93 = arith.minsi %92, %c7_i32_59 : i32
    %c0_i32_60 = arith.constant 0 : i32
    %94 = arith.cmpi eq, %c1_i32_53, %c0_i32_60 : i32
    %c3_i32_61 = arith.constant 3 : i32
    %95 = arith.cmpi eq, %c1_i32_53, %c3_i32_61 : i32
    %c0_62 = arith.constant 0 : index
    %c0_63 = arith.constant 0 : index
    %c0_64 = arith.constant 0 : index
    %c0_65 = arith.constant 0 : index
    %96 = vector.load %arg4[%c0_62, %c0_63, %c0_64, %c0_65] : memref<2x1x8x128xf32, #tpu.memory_space<vmem>>, vector<1x1x8x128xf32>
    %97 = vector.shape_cast %96 : vector<1x1x8x128xf32> to vector<8x128xf32>
    %c0_66 = arith.constant 0 : index
    %98 = arith.index_cast %91 : i32 to index
    %c0_67 = arith.constant 0 : index
    %c0_68 = arith.constant 0 : index
    %99 = vector.load %arg2[%c0_66, %98, %c0_67, %c0_68] : memref<1x8x8x128xf32, #tpu.memory_space<vmem>>, vector<1x1x8x128xf32>
    %100 = vector.shape_cast %99 : vector<1x1x8x128xf32> to vector<8x128xf32>
    %101 = arith.select %94, %97, %100 : vector<8x128xf32>
    %c0_69 = arith.constant 0 : index
    %c0_70 = arith.constant 0 : index
    %c0_71 = arith.constant 0 : index
    %c0_72 = arith.constant 0 : index
    %102 = vector.load %arg5[%c0_69, %c0_70, %c0_71, %c0_72] : memref<2x1x8x128xf32, #tpu.memory_space<vmem>>, vector<1x1x8x128xf32>
    %103 = vector.shape_cast %102 : vector<1x1x8x128xf32> to vector<8x128xf32>
    %c0_73 = arith.constant 0 : index
    %104 = arith.index_cast %93 : i32 to index
    %c0_74 = arith.constant 0 : index
    %c0_75 = arith.constant 0 : index
    %105 = vector.load %arg2[%c0_73, %104, %c0_74, %c0_75] : memref<1x8x8x128xf32, #tpu.memory_space<vmem>>, vector<1x1x8x128xf32>
    %106 = vector.shape_cast %105 : vector<1x1x8x128xf32> to vector<8x128xf32>
    %107 = arith.select %95, %103, %106 : vector<8x128xf32>
    %108 = arith.addf %101, %107 : vector<8x128xf32>
    %cst_76 = arith.constant 1.250000e-01 : f32
    %109 = vector.broadcast %cst_76 : f32 to vector<8x128xf32>
    %110 = arith.mulf %109, %108 : vector<8x128xf32>
    %c0_77 = arith.constant 0 : index
    %111 = arith.index_cast %88 : i32 to index
    %c0_78 = arith.constant 0 : index
    %c0_79 = arith.constant 0 : index
    %112 = vector.load %arg2[%c0_77, %111, %c0_78, %c0_79] : memref<1x8x8x128xf32, #tpu.memory_space<vmem>>, vector<1x1x8x128xf32>
    %113 = vector.shape_cast %112 : vector<1x1x8x128xf32> to vector<8x128xf32>
    %c0_80 = arith.constant 0 : index
    %114 = arith.index_cast %89 : i32 to index
    %c0_81 = arith.constant 0 : index
    %c0_82 = arith.constant 0 : index
    %115 = vector.load %arg2[%c0_80, %114, %c0_81, %c0_82] : memref<1x8x8x128xf32, #tpu.memory_space<vmem>>, vector<1x1x8x128xf32>
    %116 = vector.shape_cast %115 : vector<1x1x8x128xf32> to vector<8x128xf32>
    %117 = arith.addf %113, %116 : vector<8x128xf32>
    %cst_83 = arith.constant 3.750000e-01 : f32
    %118 = vector.broadcast %cst_83 : f32 to vector<8x128xf32>
    %119 = arith.mulf %118, %117 : vector<8x128xf32>
    %120 = arith.addf %110, %119 : vector<8x128xf32>
    %c1_84 = arith.constant 1 : index
    %c0_85 = arith.constant 0 : index
    %c0_86 = arith.constant 0 : index
    %c0_87 = arith.constant 0 : index
    %121 = vector.load %arg4[%c1_84, %c0_85, %c0_86, %c0_87] : memref<2x1x8x128xf32, #tpu.memory_space<vmem>>, vector<1x1x8x128xf32>
    %122 = vector.shape_cast %121 : vector<1x1x8x128xf32> to vector<8x128xf32>
    %c0_88 = arith.constant 0 : index
    %123 = arith.index_cast %91 : i32 to index
    %c0_89 = arith.constant 0 : index
    %c0_90 = arith.constant 0 : index
    %124 = vector.load %arg3[%c0_88, %123, %c0_89, %c0_90] : memref<1x8x8x128xf32, #tpu.memory_space<vmem>>, vector<1x1x8x128xf32>
    %125 = vector.shape_cast %124 : vector<1x1x8x128xf32> to vector<8x128xf32>
    %126 = arith.select %94, %122, %125 : vector<8x128xf32>
    %c1_91 = arith.constant 1 : index
    %c0_92 = arith.constant 0 : index
    %c0_93 = arith.constant 0 : index
    %c0_94 = arith.constant 0 : index
    %127 = vector.load %arg5[%c1_91, %c0_92, %c0_93, %c0_94] : memref<2x1x8x128xf32, #tpu.memory_space<vmem>>, vector<1x1x8x128xf32>
    %128 = vector.shape_cast %127 : vector<1x1x8x128xf32> to vector<8x128xf32>
    %c0_95 = arith.constant 0 : index
    %129 = arith.index_cast %93 : i32 to index
    %c0_96 = arith.constant 0 : index
    %c0_97 = arith.constant 0 : index
    %130 = vector.load %arg3[%c0_95, %129, %c0_96, %c0_97] : memref<1x8x8x128xf32, #tpu.memory_space<vmem>>, vector<1x1x8x128xf32>
    %131 = vector.shape_cast %130 : vector<1x1x8x128xf32> to vector<8x128xf32>
    %132 = arith.select %95, %128, %131 : vector<8x128xf32>
    %133 = arith.addf %126, %132 : vector<8x128xf32>
    %cst_98 = arith.constant 1.250000e-01 : f32
    %134 = vector.broadcast %cst_98 : f32 to vector<8x128xf32>
    %135 = arith.mulf %134, %133 : vector<8x128xf32>
    %c0_99 = arith.constant 0 : index
    %136 = arith.index_cast %88 : i32 to index
    %c0_100 = arith.constant 0 : index
    %c0_101 = arith.constant 0 : index
    %137 = vector.load %arg3[%c0_99, %136, %c0_100, %c0_101] : memref<1x8x8x128xf32, #tpu.memory_space<vmem>>, vector<1x1x8x128xf32>
    %138 = vector.shape_cast %137 : vector<1x1x8x128xf32> to vector<8x128xf32>
    %c0_102 = arith.constant 0 : index
    %139 = arith.index_cast %89 : i32 to index
    %c0_103 = arith.constant 0 : index
    %c0_104 = arith.constant 0 : index
    %140 = vector.load %arg3[%c0_102, %139, %c0_103, %c0_104] : memref<1x8x8x128xf32, #tpu.memory_space<vmem>>, vector<1x1x8x128xf32>
    %141 = vector.shape_cast %140 : vector<1x1x8x128xf32> to vector<8x128xf32>
    %142 = arith.addf %138, %141 : vector<8x128xf32>
    %cst_105 = arith.constant 3.750000e-01 : f32
    %143 = vector.broadcast %cst_105 : f32 to vector<8x128xf32>
    %144 = arith.mulf %143, %142 : vector<8x128xf32>
    %145 = arith.addf %135, %144 : vector<8x128xf32>
    %146 = vector.extract_strided_slice %120 {offsets = [0, 0], sizes = [1, 128], strides = [1, 1]} : vector<8x128xf32> to vector<1x128xf32>
    %c1_i32_106 = arith.constant 1 : i32
    %147 = tpu.dynamic_rotate %145 by %c1_i32_106 dim 0 : vector<8x128xf32>, i32 -> vector<8x128xf32>
    %148 = vector.shape_cast %2 : vector<8x1xi1> to vector<8x1xi1>
    %149 = vector.broadcast %148 : vector<8x1xi1> to vector<8x128xi1>
    %150 = vector.shape_cast %146 : vector<1x128xf32> to vector<1x128xf32>
    %151 = vector.broadcast %150 : vector<1x128xf32> to vector<8x128xf32>
    %152 = arith.select %149, %151, %147 : vector<8x128xi1>, vector<8x128xf32>
    %153 = vector.extract_strided_slice %145 {offsets = [7, 0], sizes = [1, 128], strides = [1, 1]} : vector<8x128xf32> to vector<1x128xf32>
    %c7_i32_107 = arith.constant 7 : i32
    %154 = tpu.dynamic_rotate %120 by %c7_i32_107 dim 0 : vector<8x128xf32>, i32 -> vector<8x128xf32>
    %155 = vector.shape_cast %4 : vector<8x1xi1> to vector<8x1xi1>
    %156 = vector.broadcast %155 : vector<8x1xi1> to vector<8x128xi1>
    %157 = vector.shape_cast %153 : vector<1x128xf32> to vector<1x128xf32>
    %158 = vector.broadcast %157 : vector<1x128xf32> to vector<8x128xf32>
    %159 = arith.select %156, %158, %154 : vector<8x128xi1>, vector<8x128xf32>
    %160 = arith.addf %120, %145 : vector<8x128xf32>
    %cst_108 = arith.constant 3.750000e-01 : f32
    %161 = vector.broadcast %cst_108 : f32 to vector<8x128xf32>
    %162 = arith.mulf %161, %160 : vector<8x128xf32>
    %163 = arith.addf %152, %159 : vector<8x128xf32>
    %cst_109 = arith.constant 1.250000e-01 : f32
    %164 = vector.broadcast %cst_109 : f32 to vector<8x128xf32>
    %165 = arith.mulf %164, %163 : vector<8x128xf32>
    %166 = arith.addf %162, %165 : vector<8x128xf32>
    %167 = arith.index_cast %c1_i32_53 : i32 to index
    %c0_110 = arith.constant 0 : index
    %c0_111 = arith.constant 0 : index
    %168 = vector.load %arg6[%167, %c0_110, %c0_111] : memref<4x8x128xf32, #tpu.memory_space<vmem>>, vector<1x8x128xf32>
    %169 = vector.shape_cast %168 : vector<1x8x128xf32> to vector<8x128xf32>
    %170 = vector.shape_cast %166 : vector<8x128xf32> to vector<1x8x128xf32>
    tpu.vector_store %arg6[%167, %c0_110, %c0_111], %170 {strides = array<i32>} : memref<4x8x128xf32, #tpu.memory_space<vmem>>, vector<1x8x128xf32>,
    %c2_i32_112 = arith.constant 2 : i32
    %c2_i32_113 = arith.constant 2 : i32
    %171 = arith.muli %c2_i32_113, %c2_i32_112 : i32
    %c1_i32_114 = arith.constant 1 : i32
    %172 = arith.addi %171, %c1_i32_114 : i32
    %c1_i32_115 = arith.constant 1 : i32
    %173 = arith.subi %171, %c1_i32_115 : i32
    %c0_i32_116 = arith.constant 0 : i32
    %174 = arith.maxsi %173, %c0_i32_116 : i32
    %c2_i32_117 = arith.constant 2 : i32
    %175 = arith.addi %171, %c2_i32_117 : i32
    %c7_i32_118 = arith.constant 7 : i32
    %176 = arith.minsi %175, %c7_i32_118 : i32
    %c0_i32_119 = arith.constant 0 : i32
    %177 = arith.cmpi eq, %c2_i32_112, %c0_i32_119 : i32
    %c3_i32_120 = arith.constant 3 : i32
    %178 = arith.cmpi eq, %c2_i32_112, %c3_i32_120 : i32
    %c0_121 = arith.constant 0 : index
    %c0_122 = arith.constant 0 : index
    %c0_123 = arith.constant 0 : index
    %c0_124 = arith.constant 0 : index
    %179 = vector.load %arg4[%c0_121, %c0_122, %c0_123, %c0_124] : memref<2x1x8x128xf32, #tpu.memory_space<vmem>>, vector<1x1x8x128xf32>
    %180 = vector.shape_cast %179 : vector<1x1x8x128xf32> to vector<8x128xf32>
    %c0_125 = arith.constant 0 : index
    %181 = arith.index_cast %174 : i32 to index
    %c0_126 = arith.constant 0 : index
    %c0_127 = arith.constant 0 : index
    %182 = vector.load %arg2[%c0_125, %181, %c0_126, %c0_127] : memref<1x8x8x128xf32, #tpu.memory_space<vmem>>, vector<1x1x8x128xf32>
    %183 = vector.shape_cast %182 : vector<1x1x8x128xf32> to vector<8x128xf32>
    %184 = arith.select %177, %180, %183 : vector<8x128xf32>
    %c0_128 = arith.constant 0 : index
    %c0_129 = arith.constant 0 : index
    %c0_130 = arith.constant 0 : index
    %c0_131 = arith.constant 0 : index
    %185 = vector.load %arg5[%c0_128, %c0_129, %c0_130, %c0_131] : memref<2x1x8x128xf32, #tpu.memory_space<vmem>>, vector<1x1x8x128xf32>
    %186 = vector.shape_cast %185 : vector<1x1x8x128xf32> to vector<8x128xf32>
    %c0_132 = arith.constant 0 : index
    %187 = arith.index_cast %176 : i32 to index
    %c0_133 = arith.constant 0 : index
    %c0_134 = arith.constant 0 : index
    %188 = vector.load %arg2[%c0_132, %187, %c0_133, %c0_134] : memref<1x8x8x128xf32, #tpu.memory_space<vmem>>, vector<1x1x8x128xf32>
    %189 = vector.shape_cast %188 : vector<1x1x8x128xf32> to vector<8x128xf32>
    %190 = arith.select %178, %186, %189 : vector<8x128xf32>
    %191 = arith.addf %184, %190 : vector<8x128xf32>
    %cst_135 = arith.constant 1.250000e-01 : f32
    %192 = vector.broadcast %cst_135 : f32 to vector<8x128xf32>
    %193 = arith.mulf %192, %191 : vector<8x128xf32>
    %c0_136 = arith.constant 0 : index
    %194 = arith.index_cast %171 : i32 to index
    %c0_137 = arith.constant 0 : index
    %c0_138 = arith.constant 0 : index
    %195 = vector.load %arg2[%c0_136, %194, %c0_137, %c0_138] : memref<1x8x8x128xf32, #tpu.memory_space<vmem>>, vector<1x1x8x128xf32>
    %196 = vector.shape_cast %195 : vector<1x1x8x128xf32> to vector<8x128xf32>
    %c0_139 = arith.constant 0 : index
    %197 = arith.index_cast %172 : i32 to index
    %c0_140 = arith.constant 0 : index
    %c0_141 = arith.constant 0 : index
    %198 = vector.load %arg2[%c0_139, %197, %c0_140, %c0_141] : memref<1x8x8x128xf32, #tpu.memory_space<vmem>>, vector<1x1x8x128xf32>
    %199 = vector.shape_cast %198 : vector<1x1x8x128xf32> to vector<8x128xf32>
    %200 = arith.addf %196, %199 : vector<8x128xf32>
    %cst_142 = arith.constant 3.750000e-01 : f32
    %201 = vector.broadcast %cst_142 : f32 to vector<8x128xf32>
    %202 = arith.mulf %201, %200 : vector<8x128xf32>
    %203 = arith.addf %193, %202 : vector<8x128xf32>
    %c1_143 = arith.constant 1 : index
    %c0_144 = arith.constant 0 : index
    %c0_145 = arith.constant 0 : index
    %c0_146 = arith.constant 0 : index
    %204 = vector.load %arg4[%c1_143, %c0_144, %c0_145, %c0_146] : memref<2x1x8x128xf32, #tpu.memory_space<vmem>>, vector<1x1x8x128xf32>
    %205 = vector.shape_cast %204 : vector<1x1x8x128xf32> to vector<8x128xf32>
    %c0_147 = arith.constant 0 : index
    %206 = arith.index_cast %174 : i32 to index
    %c0_148 = arith.constant 0 : index
    %c0_149 = arith.constant 0 : index
    %207 = vector.load %arg3[%c0_147, %206, %c0_148, %c0_149] : memref<1x8x8x128xf32, #tpu.memory_space<vmem>>, vector<1x1x8x128xf32>
    %208 = vector.shape_cast %207 : vector<1x1x8x128xf32> to vector<8x128xf32>
    %209 = arith.select %177, %205, %208 : vector<8x128xf32>
    %c1_150 = arith.constant 1 : index
    %c0_151 = arith.constant 0 : index
    %c0_152 = arith.constant 0 : index
    %c0_153 = arith.constant 0 : index
    %210 = vector.load %arg5[%c1_150, %c0_151, %c0_152, %c0_153] : memref<2x1x8x128xf32, #tpu.memory_space<vmem>>, vector<1x1x8x128xf32>
    %211 = vector.shape_cast %210 : vector<1x1x8x128xf32> to vector<8x128xf32>
    %c0_154 = arith.constant 0 : index
    %212 = arith.index_cast %176 : i32 to index
    %c0_155 = arith.constant 0 : index
    %c0_156 = arith.constant 0 : index
    %213 = vector.load %arg3[%c0_154, %212, %c0_155, %c0_156] : memref<1x8x8x128xf32, #tpu.memory_space<vmem>>, vector<1x1x8x128xf32>
    %214 = vector.shape_cast %213 : vector<1x1x8x128xf32> to vector<8x128xf32>
    %215 = arith.select %178, %211, %214 : vector<8x128xf32>
    %216 = arith.addf %209, %215 : vector<8x128xf32>
    %cst_157 = arith.constant 1.250000e-01 : f32
    %217 = vector.broadcast %cst_157 : f32 to vector<8x128xf32>
    %218 = arith.mulf %217, %216 : vector<8x128xf32>
    %c0_158 = arith.constant 0 : index
    %219 = arith.index_cast %171 : i32 to index
    %c0_159 = arith.constant 0 : index
    %c0_160 = arith.constant 0 : index
    %220 = vector.load %arg3[%c0_158, %219, %c0_159, %c0_160] : memref<1x8x8x128xf32, #tpu.memory_space<vmem>>, vector<1x1x8x128xf32>
    %221 = vector.shape_cast %220 : vector<1x1x8x128xf32> to vector<8x128xf32>
    %c0_161 = arith.constant 0 : index
    %222 = arith.index_cast %172 : i32 to index
    %c0_162 = arith.constant 0 : index
    %c0_163 = arith.constant 0 : index
    %223 = vector.load %arg3[%c0_161, %222, %c0_162, %c0_163] : memref<1x8x8x128xf32, #tpu.memory_space<vmem>>, vector<1x1x8x128xf32>
    %224 = vector.shape_cast %223 : vector<1x1x8x128xf32> to vector<8x128xf32>
    %225 = arith.addf %221, %224 : vector<8x128xf32>
    %cst_164 = arith.constant 3.750000e-01 : f32
    %226 = vector.broadcast %cst_164 : f32 to vector<8x128xf32>
    %227 = arith.mulf %226, %225 : vector<8x128xf32>
    %228 = arith.addf %218, %227 : vector<8x128xf32>
    %229 = vector.extract_strided_slice %203 {offsets = [0, 0], sizes = [1, 128], strides = [1, 1]} : vector<8x128xf32> to vector<1x128xf32>
    %c1_i32_165 = arith.constant 1 : i32
    %230 = tpu.dynamic_rotate %228 by %c1_i32_165 dim 0 : vector<8x128xf32>, i32 -> vector<8x128xf32>
    %231 = vector.shape_cast %2 : vector<8x1xi1> to vector<8x1xi1>
    %232 = vector.broadcast %231 : vector<8x1xi1> to vector<8x128xi1>
    %233 = vector.shape_cast %229 : vector<1x128xf32> to vector<1x128xf32>
    %234 = vector.broadcast %233 : vector<1x128xf32> to vector<8x128xf32>
    %235 = arith.select %232, %234, %230 : vector<8x128xi1>, vector<8x128xf32>
    %236 = vector.extract_strided_slice %228 {offsets = [7, 0], sizes = [1, 128], strides = [1, 1]} : vector<8x128xf32> to vector<1x128xf32>
    %c7_i32_166 = arith.constant 7 : i32
    %237 = tpu.dynamic_rotate %203 by %c7_i32_166 dim 0 : vector<8x128xf32>, i32 -> vector<8x128xf32>
    %238 = vector.shape_cast %4 : vector<8x1xi1> to vector<8x1xi1>
    %239 = vector.broadcast %238 : vector<8x1xi1> to vector<8x128xi1>
    %240 = vector.shape_cast %236 : vector<1x128xf32> to vector<1x128xf32>
    %241 = vector.broadcast %240 : vector<1x128xf32> to vector<8x128xf32>
    %242 = arith.select %239, %241, %237 : vector<8x128xi1>, vector<8x128xf32>
    %243 = arith.addf %203, %228 : vector<8x128xf32>
    %cst_167 = arith.constant 3.750000e-01 : f32
    %244 = vector.broadcast %cst_167 : f32 to vector<8x128xf32>
    %245 = arith.mulf %244, %243 : vector<8x128xf32>
    %246 = arith.addf %235, %242 : vector<8x128xf32>
    %cst_168 = arith.constant 1.250000e-01 : f32
    %247 = vector.broadcast %cst_168 : f32 to vector<8x128xf32>
    %248 = arith.mulf %247, %246 : vector<8x128xf32>
    %249 = arith.addf %245, %248 : vector<8x128xf32>
    %250 = arith.index_cast %c2_i32_112 : i32 to index
    %c0_169 = arith.constant 0 : index
    %c0_170 = arith.constant 0 : index
    %251 = vector.load %arg6[%250, %c0_169, %c0_170] : memref<4x8x128xf32, #tpu.memory_space<vmem>>, vector<1x8x128xf32>
    %252 = vector.shape_cast %251 : vector<1x8x128xf32> to vector<8x128xf32>
    %253 = vector.shape_cast %249 : vector<8x128xf32> to vector<1x8x128xf32>
    tpu.vector_store %arg6[%250, %c0_169, %c0_170], %253 {strides = array<i32>} : memref<4x8x128xf32, #tpu.memory_space<vmem>>, vector<1x8x128xf32>,
    %c3_i32_171 = arith.constant 3 : i32
    %c2_i32_172 = arith.constant 2 : i32
    %254 = arith.muli %c2_i32_172, %c3_i32_171 : i32
    %c1_i32_173 = arith.constant 1 : i32
    %255 = arith.addi %254, %c1_i32_173 : i32
    %c1_i32_174 = arith.constant 1 : i32
    %256 = arith.subi %254, %c1_i32_174 : i32
    %c0_i32_175 = arith.constant 0 : i32
    %257 = arith.maxsi %256, %c0_i32_175 : i32
    %c2_i32_176 = arith.constant 2 : i32
    %258 = arith.addi %254, %c2_i32_176 : i32
    %c7_i32_177 = arith.constant 7 : i32
    %259 = arith.minsi %258, %c7_i32_177 : i32
    %c0_i32_178 = arith.constant 0 : i32
    %260 = arith.cmpi eq, %c3_i32_171, %c0_i32_178 : i32
    %c3_i32_179 = arith.constant 3 : i32
    %261 = arith.cmpi eq, %c3_i32_171, %c3_i32_179 : i32
    %c0_180 = arith.constant 0 : index
    %c0_181 = arith.constant 0 : index
    %c0_182 = arith.constant 0 : index
    %c0_183 = arith.constant 0 : index
    %262 = vector.load %arg4[%c0_180, %c0_181, %c0_182, %c0_183] : memref<2x1x8x128xf32, #tpu.memory_space<vmem>>, vector<1x1x8x128xf32>
    %263 = vector.shape_cast %262 : vector<1x1x8x128xf32> to vector<8x128xf32>
    %c0_184 = arith.constant 0 : index
    %264 = arith.index_cast %257 : i32 to index
    %c0_185 = arith.constant 0 : index
    %c0_186 = arith.constant 0 : index
    %265 = vector.load %arg2[%c0_184, %264, %c0_185, %c0_186] : memref<1x8x8x128xf32, #tpu.memory_space<vmem>>, vector<1x1x8x128xf32>
    %266 = vector.shape_cast %265 : vector<1x1x8x128xf32> to vector<8x128xf32>
    %267 = arith.select %260, %263, %266 : vector<8x128xf32>
    %c0_187 = arith.constant 0 : index
    %c0_188 = arith.constant 0 : index
    %c0_189 = arith.constant 0 : index
    %c0_190 = arith.constant 0 : index
    %268 = vector.load %arg5[%c0_187, %c0_188, %c0_189, %c0_190] : memref<2x1x8x128xf32, #tpu.memory_space<vmem>>, vector<1x1x8x128xf32>
    %269 = vector.shape_cast %268 : vector<1x1x8x128xf32> to vector<8x128xf32>
    %c0_191 = arith.constant 0 : index
    %270 = arith.index_cast %259 : i32 to index
    %c0_192 = arith.constant 0 : index
    %c0_193 = arith.constant 0 : index
    %271 = vector.load %arg2[%c0_191, %270, %c0_192, %c0_193] : memref<1x8x8x128xf32, #tpu.memory_space<vmem>>, vector<1x1x8x128xf32>
    %272 = vector.shape_cast %271 : vector<1x1x8x128xf32> to vector<8x128xf32>
    %273 = arith.select %261, %269, %272 : vector<8x128xf32>
    %274 = arith.addf %267, %273 : vector<8x128xf32>
    %cst_194 = arith.constant 1.250000e-01 : f32
    %275 = vector.broadcast %cst_194 : f32 to vector<8x128xf32>
    %276 = arith.mulf %275, %274 : vector<8x128xf32>
    %c0_195 = arith.constant 0 : index
    %277 = arith.index_cast %254 : i32 to index
    %c0_196 = arith.constant 0 : index
    %c0_197 = arith.constant 0 : index
    %278 = vector.load %arg2[%c0_195, %277, %c0_196, %c0_197] : memref<1x8x8x128xf32, #tpu.memory_space<vmem>>, vector<1x1x8x128xf32>
    %279 = vector.shape_cast %278 : vector<1x1x8x128xf32> to vector<8x128xf32>
    %c0_198 = arith.constant 0 : index
    %280 = arith.index_cast %255 : i32 to index
    %c0_199 = arith.constant 0 : index
    %c0_200 = arith.constant 0 : index
    %281 = vector.load %arg2[%c0_198, %280, %c0_199, %c0_200] : memref<1x8x8x128xf32, #tpu.memory_space<vmem>>, vector<1x1x8x128xf32>
    %282 = vector.shape_cast %281 : vector<1x1x8x128xf32> to vector<8x128xf32>
    %283 = arith.addf %279, %282 : vector<8x128xf32>
    %cst_201 = arith.constant 3.750000e-01 : f32
    %284 = vector.broadcast %cst_201 : f32 to vector<8x128xf32>
    %285 = arith.mulf %284, %283 : vector<8x128xf32>
    %286 = arith.addf %276, %285 : vector<8x128xf32>
    %c1_202 = arith.constant 1 : index
    %c0_203 = arith.constant 0 : index
    %c0_204 = arith.constant 0 : index
    %c0_205 = arith.constant 0 : index
    %287 = vector.load %arg4[%c1_202, %c0_203, %c0_204, %c0_205] : memref<2x1x8x128xf32, #tpu.memory_space<vmem>>, vector<1x1x8x128xf32>
    %288 = vector.shape_cast %287 : vector<1x1x8x128xf32> to vector<8x128xf32>
    %c0_206 = arith.constant 0 : index
    %289 = arith.index_cast %257 : i32 to index
    %c0_207 = arith.constant 0 : index
    %c0_208 = arith.constant 0 : index
    %290 = vector.load %arg3[%c0_206, %289, %c0_207, %c0_208] : memref<1x8x8x128xf32, #tpu.memory_space<vmem>>, vector<1x1x8x128xf32>
    %291 = vector.shape_cast %290 : vector<1x1x8x128xf32> to vector<8x128xf32>
    %292 = arith.select %260, %288, %291 : vector<8x128xf32>
    %c1_209 = arith.constant 1 : index
    %c0_210 = arith.constant 0 : index
    %c0_211 = arith.constant 0 : index
    %c0_212 = arith.constant 0 : index
    %293 = vector.load %arg5[%c1_209, %c0_210, %c0_211, %c0_212] : memref<2x1x8x128xf32, #tpu.memory_space<vmem>>, vector<1x1x8x128xf32>
    %294 = vector.shape_cast %293 : vector<1x1x8x128xf32> to vector<8x128xf32>
    %c0_213 = arith.constant 0 : index
    %295 = arith.index_cast %259 : i32 to index
    %c0_214 = arith.constant 0 : index
    %c0_215 = arith.constant 0 : index
    %296 = vector.load %arg3[%c0_213, %295, %c0_214, %c0_215] : memref<1x8x8x128xf32, #tpu.memory_space<vmem>>, vector<1x1x8x128xf32>
    %297 = vector.shape_cast %296 : vector<1x1x8x128xf32> to vector<8x128xf32>
    %298 = arith.select %261, %294, %297 : vector<8x128xf32>
    %299 = arith.addf %292, %298 : vector<8x128xf32>
    %cst_216 = arith.constant 1.250000e-01 : f32
    %300 = vector.broadcast %cst_216 : f32 to vector<8x128xf32>
    %301 = arith.mulf %300, %299 : vector<8x128xf32>
    %c0_217 = arith.constant 0 : index
    %302 = arith.index_cast %254 : i32 to index
    %c0_218 = arith.constant 0 : index
    %c0_219 = arith.constant 0 : index
    %303 = vector.load %arg3[%c0_217, %302, %c0_218, %c0_219] : memref<1x8x8x128xf32, #tpu.memory_space<vmem>>, vector<1x1x8x128xf32>
    %304 = vector.shape_cast %303 : vector<1x1x8x128xf32> to vector<8x128xf32>
    %c0_220 = arith.constant 0 : index
    %305 = arith.index_cast %255 : i32 to index
    %c0_221 = arith.constant 0 : index
    %c0_222 = arith.constant 0 : index
    %306 = vector.load %arg3[%c0_220, %305, %c0_221, %c0_222] : memref<1x8x8x128xf32, #tpu.memory_space<vmem>>, vector<1x1x8x128xf32>
    %307 = vector.shape_cast %306 : vector<1x1x8x128xf32> to vector<8x128xf32>
    %308 = arith.addf %304, %307 : vector<8x128xf32>
    %cst_223 = arith.constant 3.750000e-01 : f32
    %309 = vector.broadcast %cst_223 : f32 to vector<8x128xf32>
    %310 = arith.mulf %309, %308 : vector<8x128xf32>
    %311 = arith.addf %301, %310 : vector<8x128xf32>
    %312 = vector.extract_strided_slice %286 {offsets = [0, 0], sizes = [1, 128], strides = [1, 1]} : vector<8x128xf32> to vector<1x128xf32>
    %c1_i32_224 = arith.constant 1 : i32
    %313 = tpu.dynamic_rotate %311 by %c1_i32_224 dim 0 : vector<8x128xf32>, i32 -> vector<8x128xf32>
    %314 = vector.shape_cast %2 : vector<8x1xi1> to vector<8x1xi1>
    %315 = vector.broadcast %314 : vector<8x1xi1> to vector<8x128xi1>
    %316 = vector.shape_cast %312 : vector<1x128xf32> to vector<1x128xf32>
    %317 = vector.broadcast %316 : vector<1x128xf32> to vector<8x128xf32>
    %318 = arith.select %315, %317, %313 : vector<8x128xi1>, vector<8x128xf32>
    %319 = vector.extract_strided_slice %311 {offsets = [7, 0], sizes = [1, 128], strides = [1, 1]} : vector<8x128xf32> to vector<1x128xf32>
    %c7_i32_225 = arith.constant 7 : i32
    %320 = tpu.dynamic_rotate %286 by %c7_i32_225 dim 0 : vector<8x128xf32>, i32 -> vector<8x128xf32>
    %321 = vector.shape_cast %4 : vector<8x1xi1> to vector<8x1xi1>
    %322 = vector.broadcast %321 : vector<8x1xi1> to vector<8x128xi1>
    %323 = vector.shape_cast %319 : vector<1x128xf32> to vector<1x128xf32>
    %324 = vector.broadcast %323 : vector<1x128xf32> to vector<8x128xf32>
    %325 = arith.select %322, %324, %320 : vector<8x128xi1>, vector<8x128xf32>
    %326 = arith.addf %286, %311 : vector<8x128xf32>
    %cst_226 = arith.constant 3.750000e-01 : f32
    %327 = vector.broadcast %cst_226 : f32 to vector<8x128xf32>
    %328 = arith.mulf %327, %326 : vector<8x128xf32>
    %329 = arith.addf %318, %325 : vector<8x128xf32>
    %cst_227 = arith.constant 1.250000e-01 : f32
    %330 = vector.broadcast %cst_227 : f32 to vector<8x128xf32>
    %331 = arith.mulf %330, %329 : vector<8x128xf32>
    %332 = arith.addf %328, %331 : vector<8x128xf32>
    %333 = arith.index_cast %c3_i32_171 : i32 to index
    %c0_228 = arith.constant 0 : index
    %c0_229 = arith.constant 0 : index
    %334 = vector.load %arg6[%333, %c0_228, %c0_229] : memref<4x8x128xf32, #tpu.memory_space<vmem>>, vector<1x8x128xf32>
    %335 = vector.shape_cast %334 : vector<1x8x128xf32> to vector<8x128xf32>
    %336 = vector.shape_cast %332 : vector<8x128xf32> to vector<1x8x128xf32>
    tpu.vector_store %arg6[%333, %c0_228, %c0_229], %336 {strides = array<i32>} : memref<4x8x128xf32, #tpu.memory_space<vmem>>, vector<1x8x128xf32>,
    %c4_i32 = arith.constant 4 : i32
    return
  }
  func.func @transform_0(%arg0: i32, %arg1: i32) -> (i32, i32, i32, i32) {
    %c0_i32 = arith.constant 0 : i32
    %c0_i32_0 = arith.constant 0 : i32
    %c0_i32_1 = arith.constant 0 : i32
    return %c0_i32, %arg1, %c0_i32_0, %arg0 : i32, i32, i32, i32
  }
  func.func @transform_1(%arg0: i32, %arg1: i32) -> (i32, i32, i32, i32) {
    %c1_i32 = arith.constant 1 : i32
    %c0_i32 = arith.constant 0 : i32
    %c0_i32_0 = arith.constant 0 : i32
    return %c1_i32, %arg1, %c0_i32, %arg0 : i32, i32, i32, i32
  }
  func.func @transform_2(%arg0: i32, %arg1: i32) -> (i32, i32, i32, i32) {
    %c8_i32 = arith.constant 8 : i32
    %0 = arith.muli %c8_i32, %arg1 : i32
    %c1_i32 = arith.constant 1 : i32
    %1 = arith.subi %0, %c1_i32 : i32
    %c0_i32 = arith.constant 0 : i32
    %2 = arith.maxsi %1, %c0_i32 : i32
    %c0_i32_0 = arith.constant 0 : i32
    %c0_i32_1 = arith.constant 0 : i32
    %c0_i32_2 = arith.constant 0 : i32
    return %c0_i32_0, %2, %c0_i32_1, %arg0 : i32, i32, i32, i32
  }
  func.func @transform_3(%arg0: i32, %arg1: i32) -> (i32, i32, i32, i32) {
    %c1_i32 = arith.constant 1 : i32
    %0 = arith.addi %arg1, %c1_i32 : i32
    %c8_i32 = arith.constant 8 : i32
    %1 = arith.muli %c8_i32, %0 : i32
    %c15_i32 = arith.constant 15 : i32
    %2 = arith.minsi %1, %c15_i32 : i32
    %c0_i32 = arith.constant 0 : i32
    %c0_i32_0 = arith.constant 0 : i32
    %c0_i32_1 = arith.constant 0 : i32
    return %c0_i32, %2, %c0_i32_0, %arg0 : i32, i32, i32, i32
  }
  func.func @transform_4(%arg0: i32, %arg1: i32) -> (i32, i32, i32) {
    %c0_i32 = arith.constant 0 : i32
    %c0_i32_0 = arith.constant 0 : i32
    return %arg1, %c0_i32, %arg0 : i32, i32, i32
  }
}

</mosaic_0001>

<bundles_post_ra>
// kernel: downsample.1
= control target key start
LH: loop header
LB: loop body
LE: loop exit
PB: predicated region body
PF: predicated region fallthrough
CT: control target
= control target key end

     0   :  { %s915_s15 = smov 0   ;;  %s917_s16 = smov 0   ;;  %s1099_s0 = inlined_call_operand.vmem [shape: f32[2,16,8,128], index: 0, kind: input, shape index: {}, may-alias: {0,1,2,3}]   ;;  %s1100_s1 = inlined_call_operand.vmem [shape: f32[2,16,8,128], index: 1, kind: input, shape index: {}, may-alias: {0,1,2,3}]   ;;  %s1101_s2 = inlined_call_operand.vmem [shape: f32[2,16,8,128], index: 2, kind: input, shape index: {}, may-alias: {0,1,2,3}]   ;;  %s1102_s3 = inlined_call_operand.vmem [shape: f32[2,16,8,128], index: 3, kind: input, shape index: {}, may-alias: {0,1,2,3}]   ;;  %s1103_s4 = inlined_call_operand.vmem [shape: f32[8,8,128], index: 4, kind: output, shape index: {}]  }
   0x1   :  { %s919_s17 = smov 0   ;;  %s921_s18 = smov 0  }
   0x2   :  { %s923_s19 = smov 0   ;;  %s925_s20 = smov 0  }
   0x3   :  { %s927_s21 = smov 0  }
   0x4 LB: > { %s23_s22 = sadd.s32 1, %s884_s20  ;;  %s714_s23 = sshll.u32 %s884_s20, 3  ;;  %s888_s21 = sphi %s927_s21, %s14_s21   ;;  %s884_s20 = sphi %s925_s20, %s1112_s20   ;;  %s880_s19 = sphi %s923_s19, %s1111_s19   ;;  %s876_s18 = sphi %s921_s18, %s1110_s18   ;;  %s872_s17 = sphi %s919_s17, %s1109_s17   ;;  %s868_s16 = sphi %s917_s16, %s1108_s16   ;;  %s864_s15 = sphi %s915_s15, %s1107_s15  }
   0x5   : > { %p24_p0 = scmp.ge.s32.totalorder %s23_s22, 2  ;;  %s715_s24 = sadd.s32 4294967295, %s714_s23 }
   0x6   : > { %p88_p1 = scmp.gt.s32.totalorder %s715_s24, 0  ;;  %s99_s25 = sadd.s32 1, %s876_s18 }
   0x7   : > { %s1114_s22 = smov (%p24_p0, %s23_s22), 0  ;;  %p106_p2 = scmp.ne.s32.totalorder %s876_s18, %s872_s17 }
   0x8   : > { %s1116_s24 = smov (!%p88_p1, %s715_s24), 0  ;;  %s716_s26 = sshll.u32 %s1114_s22, 3 }
   0x9   : > { %s717_s27 = sadd.s32 4294967295, %s716_s26  ;;  %p107_p3 = scmp.eq.s32.totalorder %s888_s21, 0 }
   0xa   : > { %p92_p4 = scmp.gt.s32.totalorder %s717_s27, 0  ;;  %s773_s28 = sadd.s32 8, %s714_s23 }
   0xb   : > { %p963_p5 = por %p107_p3, %p106_p2  ;;  %p124_p6 = scmp.lt.s32.totalorder %s773_s28, 15 }
   0xc   : > { %s1118_s27 = smov (!%p92_p4, %s717_s27), 0  ;;  %s775_s5 = sadd.s32 8, %s716_s26 }
   0xd   : > { %s1120_s28 = smov (!%p124_p6, %s773_s28), 15  ;;  %s94_s30 = ssub.s32 %s1116_s24, %s1118_s27 }
   0xe   : > { %p97_p7 = scmp.eq.s32.totalorder %s94_s30, 0  ;;  %p128_p8 = scmp.lt.s32.totalorder %s775_s5, 15 }
   0xf   : > { %p142_p9 = scmp.ne.s32.totalorder %s868_s16, %s864_s15  ;;  %s135_s9 = sadd.s32 1, %s868_s16 }
  0x10   : > { %s973_s6 = scalar_select %p97_p7, %s876_s18, %s99_s25  }
  0x11   : > { %s1122_s5 = smov (!%p128_p8, %s775_s5), 15  ;;  %p977_p10 = por %p142_p9, %p107_p3 }
  0x12   : > { %s130_s8 = ssub.s32 %s1120_s28, %s1122_s5  ;;  %p721_p12 = scmp.ge.s32.totalorder %s888_s21, 2 }
  0x13   : > { %p133_p11 = scmp.eq.s32.totalorder %s130_s8, 0 }
  0x14   : > { %196 = sbr.rel (%p721_p12) target bundleno = 37 (0x25), region = 16 }
  0x15   : > { %s984_s10 = scalar_select %p133_p11, %s868_s16, %s135_s9  }
  0x19   : > { %224 = sbr.rel (!%p963_p5) target bundleno = 31 (0x1f), region = 28  ;;  %s226_s11 = sand.u32 (%p963_p5), 1, %s876_s18  }
  0x1a   : > { %s725_s12 = sshll.u32 (%p963_p5), %s1116_s24, 3  ;;  %s722_s13 = sshll.u32 (%p963_p5), %s226_s11, 4 }
  0x1b   : > { %s235_s25 = scalar_lea.vmem (%p963_p5), %s1101_s2, %s725_s12  ;;  %s228_s26 = scalar_lea.vmem (%p963_p5), [#allocation2], %s722_s13 }
  0x1c   : > { %v266_v0 = vld [vmem:[%s235_s25] sm:$0xff] (%p963_p5) }
  0x1d   : > { %v268_v1 = vld [vmem:[%s235_s25 + $0x80] sm:$0xff] (%p963_p5)  ;;  %267 = vst [vmem:[%s228_s26] sm:$0xff] (%p963_p5), %v266_v0 }
  0x1e   : > { %269 = vst [vmem:[%s228_s26 + $0x8] sm:$0xff] %v268_v1 }
  0x1f PF: > { %275 = sbr.rel (!%p977_p10) target bundleno = 37 (0x25), region = 66  ;;  %s277_s27 = sand.u32 (%p977_p10), 1, %s868_s16  }
  0x20   : > { %s728_s29 = sshll.u32 (%p977_p10), %s1120_s28, 3  ;;  %s726_s30 = sshll.u32 (%p977_p10), %s277_s27, 4 }
  0x21   : > { %s286_s8 = scalar_lea.vmem (%p977_p10), %s1102_s3, %s728_s29  ;;  %s279_s9 = scalar_lea.vmem (%p977_p10), [#allocation3], %s726_s30 }
  0x22   : > { %v317_v2 = vld [vmem:[%s286_s8] sm:$0xff] (%p977_p10) }
  0x23   : > { %v319_v3 = vld [vmem:[%s286_s8 + $0x80] sm:$0xff] (%p977_p10)  ;;  %318 = vst [vmem:[%s279_s9] sm:$0xff] (%p977_p10), %v317_v2 }
  0x24   : > { %320 = vst [vmem:[%s279_s9 + $0x8] sm:$0xff] %v319_v3 }
  0x25 PF: > { %p729_p13 = scmp.ge.s32.totalorder %s888_s21, 1  ;;  %p325_p0 = scmp.lt.s32.totalorder %s888_s21, 3 }
  0x27   : > { %p326_p1 = pnand %p729_p13, %p325_p0 }
  0x28   : > { %s332_s28 = sand.u32 (!%p326_p1), 1, %s872_s17   ;;  %s732_s7 = sshll.u32 (!%p326_p1), %s880_s19, 3 }
  0x29   : > { %329 = sbr.rel (%p326_p1) target bundleno = 81 (0x51), region = 104  ;;  %s730_s11 = sshll.u32 (!%p326_p1), %s332_s28, 4 }
  0x2a   : > { %p389_p2 = scmp.lt.s32.totalorder (!%p326_p1), %s732_s7, 15  ;;  %s736_s13 = sshll.u32 (!%p326_p1), %s880_s19, 2 }
  0x2b   : > { %s334_s14 = scalar_lea.vmem (!%p326_p1), [#allocation2], %s730_s11  ;;  %s339_s30 = sand.u32 (!%p326_p1), 1, %s864_s15  }
  0x2c   : > { %p1027_p3 = scmp.lt.s32.totalorder (!%p326_p1), %s736_s13, 7  ;;  %s1039_s15 = sshll.u32 (!%p326_p1), %s339_s30, 4 }
  0x2d   : > { %s341_s5 = scalar_lea.vmem (!%p326_p1), [#allocation3], %s1039_s15 }
  0x2e   : > { %v424_v4 = vlaneseq  ;;  %s1124_s7 = smov (!%p389_p2, %s732_s7), 15  ;;  %v428_v6 = vld [vmem:[%s334_s14] sm:$0xff]  ;;  %v740_v7 = vld [vmem:[%s334_s14 + $0x8] sm:$0xff]  ;;  %s1126_s13 = smov (!%p1027_p3, %s736_s13), 7 }
  0x2f   : > { %s733_s12 = sshll.u32 %s1124_s7, 3  ;;  %v538_v54 = vld [vmem:[%s341_s5] sm:$0xff]  ;;  %s737_s19 = sshll.u32 %s1126_s13, 3 }
  0x30   : > { %v1006_v5 = vshrl.u32 %v424_v4, 7  ;;  %s1011_s26 = scalar_lea.vmem %s1099_s0, %s733_s12  ;;  %s1016_s29 = scalar_lea.vmem %s1100_s1, %s733_s12  ;;  %v766_v4 = vld [vmem:[%s341_s5 + $0x8] sm:$0xff] }
  0x31   : > { %v738_v8 = vld [vmem:[%s1011_s26 + $0x10] sm:$0xff]  ;;  %v433_v9 = vld [vmem:[%s1011_s26] sm:$0xff]  ;;  %v739_v10 = vld [vmem:[%s1011_s26 + $0x8] sm:$0xff]  ;;  %s1064_s28 = scalar_lea.vmem %s1103_s4, %s737_s19 }
  0x32   : > { %v431_v11 = vadd.f32 %v738_v8, %v428_v6  ;;  %v436_v12 = vadd.f32 %v739_v10, %v433_v9  ;;  %v741_v13 = vld [vmem:[%s1016_s29 + $0x90] sm:$0xff]  ;;  %v742_v14 = vld [vmem:[%s1016_s29 + $0x80] sm:$0xff]  ;;  %v743_v15 = vld [vmem:[%s1016_s29 + $0x88] sm:$0xff]  ;;  %vm426_vm0 = vcmp.eq.s32.totalorder %v1006_v5, 0  ;;  %vm427_vm1 = vcmp.eq.s32.totalorder %v1006_v5, 7 }
  0x33   : > { %v443_v16 = vadd.f32 %v741_v13, %v740_v7  ;;  %v448_v17 = vadd.f32 %v743_v15, %v742_v14  ;;  %v745_v18 = vld [vmem:[%s1011_s26 + $0x20] sm:$0xff]  ;;  %v747_v19 = vld [vmem:[%s1011_s26 + $0x18] sm:$0xff]  ;;  %v754_v26 = vld [vmem:[%s1011_s26 + $0x30] sm:$0xff] }
  0x34   : > { %v749_v20 = vld [vmem:[%s1016_s29 + $0xa0] sm:$0xff]  ;;  %v432_v21 = vmul.f32 0.125, %v431_v11  ;;  %v437_v22 = vmul.f32 0.375, %v436_v12  ;;  %v470_v23 = vadd.f32 %v745_v18, %v739_v10  ;;  %v475_v24 = vadd.f32 %v747_v19, %v738_v8  ;;  %v751_v25 = vld [vmem:[%s1016_s29 + $0x98] sm:$0xff]  ;;  %v756_v27 = vld [vmem:[%s1011_s26 + $0x28] sm:$0xff] }
  0x35   : > { %v444_v28 = vmul.f32 0.125, %v443_v16  ;;  %v449_v29 = vmul.f32 0.375, %v448_v17  ;;  %v481_v30 = vadd.f32 %v749_v20, %v743_v15  ;;  %v486_v31 = vadd.f32 %v751_v25, %v741_v13  ;;  %v758_v40 = vld [vmem:[%s1016_s29 + $0xb0] sm:$0xff]  ;;  %v760_v53 = vld [vmem:[%s1016_s29 + $0xa8] sm:$0xff]  ;;  %v764_v3 = vld [vmem:[%s1011_s26 + $0x38] sm:$0xff] }
  0x36   : > { %v438_v32 = vadd.f32 %v437_v22, %v432_v21  ;;  %v471_v33 = vmul.f32 0.125, %v470_v23  ;;  %v476_v34 = vmul.f32 0.375, %v475_v24  ;;  %v505_v35 = vadd.f32 %v754_v26, %v747_v19  ;;  %v768_v6 = vld [vmem:[%s1016_s29 + $0xb8] sm:$0xff] }
  0x37   : > { %v450_v36 = vadd.f32 %v449_v29, %v444_v28  ;;  %v482_v37 = vmul.f32 0.125, %v481_v30  ;;  %v487_v38 = vmul.f32 0.375, %v486_v31  ;;  %v510_v39 = vadd.f32 %v756_v27, %v745_v18 }
  0x38   : > { %v454_v41 = vperm.slane %v438_v32, 0  ;;  %v456_v42 = vrot.slane %v438_v32, 1  ;;  %v477_v43 = vadd.f32 %v476_v34, %v471_v33  ;;  %v506_v44 = vmul.f32 0.125, %v505_v35 }
  0x39   : > { %v451_v45 = vrot.slane %v450_v36, 7  ;;  %v459_v46 = vperm.slane %v450_v36, 7  ;;  %v461_v47 = vadd.f32 %v450_v36, %v438_v32  ;;  %v488_v48 = vadd.f32 %v487_v38, %v482_v37 }
  0x3a   : > { %v490_v49 = vperm.slane %v477_v43, 0  ;;  %v492_v50 = vrot.slane %v477_v43, 1  ;;  %v511_v51 = vmul.f32 0.375, %v510_v39  ;;  %v516_v52 = vadd.f32 %v758_v40, %v751_v25 }
  0x3b   : > { %v455_v55 = vsel %vm426_vm0, %v454_v41, %v451_v45  ;;  %v460_v56 = vsel %vm427_vm1, %v459_v46, %v456_v42  ;;  %v462_v57 = vmul.f32 0.375, %v461_v47  ;;  %v489_v58 = vrot.slane %v488_v48, 7 }
  0x3c   : > { %v463_v59 = vadd.f32 %v460_v56, %v455_v55  ;;  %v493_v60 = vperm.slane %v488_v48, 7  ;;  %v495_v61 = vadd.f32 %v488_v48, %v477_v43  ;;  %v512_v62 = vadd.f32 %v511_v51, %v506_v44 }
  0x3d   : > { %v491_v63 = vsel %vm426_vm0, %v490_v49, %v489_v58  ;;  %v517_v0 = vmul.f32 0.125, %v516_v52  ;;  %v521_v1 = vadd.f32 %v760_v53, %v749_v20  ;;  %v539_v2 = vadd.f32 %v756_v27, %v538_v54 }
  0x3e   : > { %v464_v7 = vmul.f32 0.125, %v463_v59  ;;  %v494_v8 = vsel %vm427_vm1, %v493_v60, %v492_v50  ;;  %v496_v9 = vmul.f32 0.375, %v495_v61  ;;  %v544_v14 = vadd.f32 %v764_v3, %v754_v26 }
  0x3f   : > { %v497_v10 = vadd.f32 %v494_v8, %v491_v63  ;;  %v522_v11 = vmul.f32 0.375, %v521_v1  ;;  %v540_v12 = vmul.f32 0.125, %v539_v2  ;;  %v550_v15 = vadd.f32 %v766_v4, %v760_v53 }
  0x40   : > { %v465_v13 = vadd.f32 %v464_v7, %v462_v57  ;;  %v555_v16 = vadd.f32 %v768_v6, %v758_v40  ;;  %v525_v19 = vperm.slane %v512_v62, 0  ;;  %v527_v20 = vrot.slane %v512_v62, 1 }
  0x41   : > { %v498_v17 = vmul.f32 0.125, %v497_v10  ;;  %v523_v18 = vadd.f32 %v522_v11, %v517_v0  ;;  %v545_v21 = vmul.f32 0.375, %v544_v14  ;;  %v551_v22 = vmul.f32 0.125, %v550_v15 }
  0x42   : > { %466 = vst [vmem:[%s1064_s28] sm:$0xff] %v465_v13  ;;  %v556_v23 = vmul.f32 0.375, %v555_v16 }
  0x43   : > { %v499_v24 = vadd.f32 %v498_v17, %v496_v9  ;;  %v524_v25 = vrot.slane %v523_v18, 7  ;;  %v528_v27 = vperm.slane %v523_v18, 7  ;;  %v530_v28 = vadd.f32 %v523_v18, %v512_v62 }
  0x44   : > { %v546_v29 = vadd.f32 %v545_v21, %v540_v12  ;;  %v557_v30 = vadd.f32 %v556_v23, %v551_v22 }
  0x45   : > { %752 = vst [vmem:[%s1064_s28 + $0x8] sm:$0xff] %v499_v24  ;;  %v526_v26 = vsel %vm426_vm0, %v525_v19, %v524_v25  ;;  %v529_v31 = vsel %vm427_vm1, %v528_v27, %v527_v20  ;;  %v531_v32 = vmul.f32 0.375, %v530_v28 }
  0x46   : > { %v532_v33 = vadd.f32 %v529_v31, %v526_v26  ;;  %v558_v34 = vrot.slane %v557_v30, 7  ;;  %v559_v35 = vperm.slane %v546_v29, 0  ;;  %v561_v36 = vrot.slane %v546_v29, 1 }
  0x47   : > { %v562_v37 = vperm.slane %v557_v30, 7  ;;  %v564_v38 = vadd.f32 %v557_v30, %v546_v29 }
  0x48   : > { %v533_v39 = vmul.f32 0.125, %v532_v33  ;;  %v560_v40 = vsel %vm426_vm0, %v559_v35, %v558_v34 }
  0x49   : > { %v563_v41 = vsel %vm427_vm1, %v562_v37, %v561_v36  ;;  %v565_v43 = vmul.f32 0.375, %v564_v38 }
  0x4a   : > { %v534_v42 = vadd.f32 %v533_v39, %v531_v32  ;;  %v566_v44 = vadd.f32 %v563_v41, %v560_v40 }
  0x4c   : > { %761 = vst [vmem:[%s1064_s28 + $0x10] sm:$0xff] %v534_v42  ;;  %v567_v45 = vmul.f32 0.125, %v566_v44 }
  0x4e   : > { %v568_v46 = vadd.f32 %v567_v45, %v565_v43 }
  0x50   : > { %769 = vst [vmem:[%s1064_s28 + $0x18] sm:$0xff] %v568_v46 }
  0x51 PF: > { %s14_s21 = sadd.s32 1, %s888_s21   ;;  %s1107_s15 = smov %s868_s16 }
  0x52   : > { %p11_p4 = scmp.ge.s32.totalorder %s14_s21, 4   ;;  %s1108_s16 = smov %s984_s10 }
  0x53   : > { %s1109_s17 = smov %s876_s18  ;;  %s1110_s18 = smov %s973_s6 }
  0x54   : > { %s1111_s19 = smov %s884_s20  ;;  %s1112_s20 = smov %s1114_s22 }
  0x55   :  { %13 = sbr.rel (!%p11_p4) target bundleno = 4 (0x4), region = 180 }

</bundles_post_ra>
